<compile_context>
chip_gen: v7x
topology: tpu7x:2x2x1
jax: 0.10.0
libtpu: 0.0.40
codegen_flags: <defaults>
</compile_context>

<pallas_src>
import math
import functools

import jax
import jax.numpy as jnp
from jax.experimental import pallas as pl
from jax.experimental.pallas import tpu as pltpu


# ----------------------------------------------------------------------------
# small helpers
# ----------------------------------------------------------------------------
def _pick_tile(dim, preferred, align):
    """Largest tile <= preferred that divides `dim` and is a multiple of
    `align`; falls back to the full dim (single block)."""
    if dim <= preferred:
        return dim
    t = (preferred // align) * align
    while t >= align:
        if dim % t == 0:
            return t
        t -= align
    return dim


def _compiler_params(semantics, working_set_bytes):
    # Explicit scoped-VMEM budget: cover double-buffered tiles + accumulators
    # with headroom, clamped to v7x's 64 MiB physical VMEM.
    limit = int(min(max(3 * working_set_bytes + (8 << 20), 32 << 20), 64 << 20))
    return pltpu.CompilerParams(dimension_semantics=semantics,
                                vmem_limit_bytes=limit)


# ----------------------------------------------------------------------------
# Kernel 1: fused BERT embedding (tok + seg + pos), one sequence per grid step.
#   tok table : HBM, gathered row-by-row with double-buffered manual DMAs
#   seg table : tiny, VMEM-resident, one-hot @ table on the MXU
#   pos table : VMEM-resident, identity gather (positions are arange(S))
# ----------------------------------------------------------------------------
def _embedding_kernel(tok_ids_ref,     # SMEM scalar-prefetch (B, S) int32
                      seg_ids_ref,     # VMEM (1, 1, S) int32
                      seg_tab_ref,     # VMEM (n_seg, D) resident
                      pos_tab_ref,     # VMEM (S, D) resident
                      tok_tab_ref,     # HBM  (V, D)
                      out_ref,         # VMEM (1, S, D)
                      tok_rows,        # VMEM scratch (S, D)
                      sems):           # DMA semaphores (2,)
    b = pl.program_id(0)
    S = out_ref.shape[1]

    def row_copy(j, slot):
        tid = tok_ids_ref[b, j]
        return pltpu.make_async_copy(tok_tab_ref.at[pl.ds(tid, 1)],
                                     tok_rows.at[pl.ds(j, 1)],
                                     sems.at[slot])

    # double-buffered row gather of the token embedding table from HBM
    row_copy(0, 0).start()

    @pl.loop(0, S)
    def _(j):
        slot = j % 2

        @pl.when(j + 1 < S)
        def _():
            row_copy(j + 1, 1 - slot).start()

        row_copy(j, slot).wait()

    tok_emb = tok_rows[...].astype(jnp.float32)                       # (S, D)

    # segment table: tiny vocabulary -> one-hot @ table (VMEM-resident)
    n_seg = seg_tab_ref.shape[0]
    seg_ids = seg_ids_ref[0]                                          # (1, S)
    row_ids = jax.lax.broadcasted_iota(jnp.int32, (n_seg, S), 0)
    onehot = (row_ids == seg_ids).astype(seg_tab_ref.dtype)           # (n_seg, S)
    seg_emb = jax.lax.dot_general(onehot, seg_tab_ref[...],
                                  (((0,), (0,)), ((), ())),
                                  preferred_element_type=jnp.float32)

    # positions are arange(S): identity gather -> just the resident table
    pos_emb = pos_tab_ref[...].astype(jnp.float32)

    out_ref[0] = (tok_emb + seg_emb + pos_emb).astype(out_ref.dtype)


def bert_embedding(tok_ids, seg_ids, tok_table, seg_table, pos_table):
    """tok_ids/seg_ids: (B, S) int32. Returns (B*S, D) embeddings."""
    B, S = tok_ids.shape
    V, D = tok_table.shape
    assert D % 128 == 0, "embed_dim must be lane-aligned (multiple of 128)"
    # module semantics: pos_embed(arange(max_len)) broadcast -> requires S == max_len
    assert pos_table.shape[0] == S
    dtype = tok_table.dtype
    esz = jnp.dtype(dtype).itemsize

    tok_ids = jnp.clip(tok_ids.astype(jnp.int32), 0, V - 1)
    seg_ids = jnp.clip(seg_ids.astype(jnp.int32), 0, seg_table.shape[0] - 1)
    seg_ids3 = seg_ids.reshape(B, 1, S)

    grid_spec = pltpu.PrefetchScalarGridSpec(
        num_scalar_prefetch=1,
        grid=(B,),
        in_specs=[
            pl.BlockSpec((1, 1, S), lambda b, ids: (b, 0, 0)),      # seg ids
            pl.BlockSpec(seg_table.shape, lambda b, ids: (0, 0)),   # seg table
            pl.BlockSpec(pos_table.shape, lambda b, ids: (0, 0)),   # pos table
            pl.BlockSpec(memory_space=pl.ANY),                      # tok table (HBM)
        ],
        out_specs=pl.BlockSpec((1, S, D), lambda b, ids: (b, 0, 0)),
        scratch_shapes=[pltpu.VMEM((S, D), dtype),
                        pltpu.SemaphoreType.DMA((2,))],
    )
    working = esz * (seg_table.size + pos_table.size + 2 * S * D) + 4 * B * S

    out = pl.pallas_call(
        _embedding_kernel,
        grid_spec=grid_spec,
        out_shape=jax.ShapeDtypeStruct((B, S, D), dtype),
        compiler_params=_compiler_params(("parallel",), working),
    )(tok_ids, seg_ids3, seg_table, pos_table, tok_table)
    return out.reshape(B * S, D)


# ----------------------------------------------------------------------------
# Kernel 2: tiled matmul + bias (+ optional relu)      y = x @ w + b
# ----------------------------------------------------------------------------
def _linear_kernel(x_ref, w_ref, b_ref, o_ref, acc_ref, *, activation):
    k = pl.program_id(2)

    @pl.when(k == 0)
    def _():
        acc_ref[...] = jnp.zeros_like(acc_ref)

    acc_ref[...] += jnp.dot(x_ref[...], w_ref[...],
                            preferred_element_type=jnp.float32)

    @pl.when(k == pl.num_programs(2) - 1)
    def _():
        y = acc_ref[...] + b_ref[...].astype(jnp.float32)
        if activation == "relu":
            y = jnp.maximum(y, 0.0)
        o_ref[...] = y.astype(o_ref.dtype)


def linear(x, w, b, *, activation=None):
    """x: (M, K), w: (K, Nout), b: (Nout,)."""
    M, K = x.shape
    K2, Nout = w.shape
    assert K == K2
    tm = _pick_tile(M, 256, 8)
    tn = _pick_tile(Nout, 256, 128)
    tk = _pick_tile(K, 512, 128)
    esz = jnp.dtype(x.dtype).itemsize
    working = esz * (tm * tk + tk * tn + tn + tm * tn) + 4 * tm * tn

    return pl.pallas_call(
        functools.partial(_linear_kernel, activation=activation),
        grid=(M // tm, Nout // tn, K // tk),
        in_specs=[
            pl.BlockSpec((tm, tk), lambda i, j, k: (i, k)),
            pl.BlockSpec((tk, tn), lambda i, j, k: (k, j)),
            pl.BlockSpec((1, tn), lambda i, j, k: (0, j)),
        ],
        out_specs=pl.BlockSpec((tm, tn), lambda i, j, k: (i, j)),
        out_shape=jax.ShapeDtypeStruct((M, Nout), x.dtype),
        scratch_shapes=[pltpu.VMEM((tm, tn), jnp.float32)],
        compiler_params=_compiler_params(
            ("parallel", "parallel", "arbitrary"), working),
    )(x, w, b.reshape(1, Nout))


# ----------------------------------------------------------------------------
# Kernel 3: matmul + bias + residual + LayerNorm, fused in the k-epilogue.
#           y = LayerNorm(residual + x @ w + b)   (LN over the full D row)
# ----------------------------------------------------------------------------
def _linear_res_ln_kernel(x_ref, w_ref, b_ref, r_ref, g_ref, be_ref,
                          o_ref, acc_ref, *, eps):
    k = pl.program_id(1)

    @pl.when(k == 0)
    def _():
        acc_ref[...] = jnp.zeros_like(acc_ref)

    acc_ref[...] += jnp.dot(x_ref[...], w_ref[...],
                            preferred_element_type=jnp.float32)

    @pl.when(k == pl.num_programs(1) - 1)
    def _():
        y = (acc_ref[...] + b_ref[...].astype(jnp.float32)
             + r_ref[...].astype(jnp.float32))
        mean = jnp.mean(y, axis=-1, keepdims=True)
        yc = y - mean
        var = jnp.mean(yc * yc, axis=-1, keepdims=True)
        y = yc * jax.lax.rsqrt(var + eps)
        y = y * g_ref[...].astype(jnp.float32) + be_ref[...].astype(jnp.float32)
        o_ref[...] = y.astype(o_ref.dtype)


def linear_residual_layernorm(x, w, b, residual, gamma, beta, *, eps=1e-5):
    M, K = x.shape
    K2, D = w.shape
    assert K == K2 and residual.shape == (M, D)
    tm = _pick_tile(M, 256, 8)
    tk = _pick_tile(K, 512, 128)
    esz = jnp.dtype(x.dtype).itemsize
    working = esz * (tm * tk + tk * D + 2 * tm * D) + 4 * (tm * D + 3 * D)

    return pl.pallas_call(
        functools.partial(_linear_res_ln_kernel, eps=eps),
        grid=(M // tm, K // tk),
        in_specs=[
            pl.BlockSpec((tm, tk), lambda i, k: (i, k)),
            pl.BlockSpec((tk, D), lambda i, k: (k, 0)),
            pl.BlockSpec((1, D), lambda i, k: (0, 0)),
            pl.BlockSpec((tm, D), lambda i, k: (i, 0)),   # residual
            pl.BlockSpec((1, D), lambda i, k: (0, 0)),    # gamma
            pl.BlockSpec((1, D), lambda i, k: (0, 0)),    # beta
        ],
        out_specs=pl.BlockSpec((tm, D), lambda i, k: (i, 0)),
        out_shape=jax.ShapeDtypeStruct((M, D), x.dtype),
        scratch_shapes=[pltpu.VMEM((tm, D), jnp.float32)],
        compiler_params=_compiler_params(("parallel", "arbitrary"), working),
    )(x, w, b.reshape(1, D), residual, gamma.reshape(1, D), beta.reshape(1, D))


# ----------------------------------------------------------------------------
# Kernel 4: softmax attention; reads q/k/v as column blocks of the (B,S,3D)
#           qkv tensor, G heads per grid step, lane-dense (S, G*dh) output.
# ----------------------------------------------------------------------------
def _attention_kernel(q_ref, k_ref, v_ref, o_ref, *,
                      heads_per_block, head_dim, scale):
    G, dh = heads_per_block, head_dim
    qb = q_ref[0]                                                    # (S, G*dh)
    kb = k_ref[0]
    vb = v_ref[0]
    outs = []
    for h in range(G):                                               # static loop
        q = qb[:, h * dh:(h + 1) * dh].astype(jnp.float32)           # (S, dh)
        k = kb[:, h * dh:(h + 1) * dh].astype(jnp.float32)
        v = vb[:, h * dh:(h + 1) * dh]
        s = jax.lax.dot_general(q, k, (((1,), (1,)), ((), ())),
                                preferred_element_type=jnp.float32) * scale
        m = jnp.max(s, axis=-1, keepdims=True)
        p = jnp.exp(s - m)
        denom = jnp.sum(p, axis=-1, keepdims=True)
        p = p * pl.reciprocal(denom, approx=True)        # divide on the EUP slot
        outs.append(jnp.dot(p.astype(v.dtype), v,
                            preferred_element_type=jnp.float32))
    # one lane-dense (S, G*dh) store instead of G masked sub-lane stores
    o_ref[0] = jnp.concatenate(outs, axis=-1).astype(o_ref.dtype)


def attention(qkv, *, batch, seq, embed_dim, num_heads):
    """qkv: (B*S, 3D) packed projections -> (B*S, D) attention output."""
    B, S, D, H = batch, seq, embed_dim, num_heads
    dh = D // H
    assert dh * H == D
    # pack G heads per step so the output tile is >=128 lanes wide
    G = H
    for cand in range(H, 0, -1):
        if H % cand == 0 and (cand * dh) % 128 == 0 and cand * dh <= 512:
            G = cand
            break
    Gb = H // G
    blk = (1, S, G * dh)
    qkv3 = qkv.reshape(B, S, 3 * D)            # metadata reshape, no transpose
    scale = 1.0 / math.sqrt(dh)
    esz = jnp.dtype(qkv.dtype).itemsize
    working = esz * 4 * S * G * dh + 4 * (S * S + 2 * S * dh)

    out = pl.pallas_call(
        functools.partial(_attention_kernel, heads_per_block=G,
                          head_dim=dh, scale=scale),
        grid=(B, Gb),
        in_specs=[
            pl.BlockSpec(blk, lambda b, g: (b, 0, g)),               # q columns
            pl.BlockSpec(blk, lambda b, g: (b, 0, Gb + g)),          # k columns
            pl.BlockSpec(blk, lambda b, g: (b, 0, 2 * Gb + g)),      # v columns
        ],
        out_specs=pl.BlockSpec(blk, lambda b, g: (b, 0, g)),
        out_shape=jax.ShapeDtypeStruct((B, S, D), qkv.dtype),
        compiler_params=_compiler_params(("parallel", "parallel"), working),
    )(qkv3, qkv3, qkv3)
    return out.reshape(B * S, D)


# ----------------------------------------------------------------------------
# Full BERT forward built from the kernels above.
# ----------------------------------------------------------------------------
def bert_forward(params, tok_ids, seg_ids, *, compute_dtype=jnp.float32):
    B, S = tok_ids.shape
    D = params["tok_table"].shape[1]
    H = params["num_heads"]

    cast = lambda t: t.astype(compute_dtype)

    x = bert_embedding(tok_ids, seg_ids,
                       cast(params["tok_table"]),
                       cast(params["seg_table"]),
                       cast(params["pos_table"]))                    # (N, D)

    for layer in params["layers"]:
        # fused QKV projection; heads are pure column slices of the (.,3D)
        # output, so no head split/merge transposes between kernels.
        qkv = linear(x, cast(layer["w_in"]), cast(layer["b_in"]))    # (N, 3D)
        a = attention(qkv, batch=B, seq=S, embed_dim=D, num_heads=H) # (N, D)
        # output projection + bias + residual + LayerNorm in one kernel
        x = linear_residual_layernorm(a, cast(layer["w_out"]), cast(layer["b_out"]),
                                      x, layer["ln1_g"], layer["ln1_b"])
        # feed-forward (relu) with the second projection fused with residual+LN
        h = linear(x, cast(layer["w_ff1"]), cast(layer["b_ff1"]), activation="relu")
        x = linear_residual_layernorm(h, cast(layer["w_ff2"]), cast(layer["b_ff2"]),
                                      x, layer["ln2_g"], layer["ln2_b"])

    return x.reshape(B, S, D)


# ----------------------------------------------------------------------------
# Deterministic parameter init + pure-JAX reference.
# ----------------------------------------------------------------------------
def init_params(key, *, vocab_size, n_segment, max_len, embed_dim,
                n_layers, attn_heads):
    keys = jax.random.split(key, 3 + n_layers)
    params = {
        "num_heads": attn_heads,
        "tok_table": jax.random.normal(keys[0], (vocab_size, embed_dim), jnp.float32),
        "seg_table": jax.random.normal(keys[1], (n_segment, embed_dim), jnp.float32),
        "pos_table": jax.random.normal(keys[2], (max_len, embed_dim), jnp.float32),
        "layers": [],
    }
    ffn = 4 * embed_dim
    for li in range(n_layers):
        ks = jax.random.split(keys[3 + li], 8)

        def u(kk, shape, fan_in):
            bound = 1.0 / math.sqrt(fan_in)
            return jax.random.uniform(kk, shape, jnp.float32, -bound, bound)

        params["layers"].append({
            "w_in":  u(ks[0], (embed_dim, 3 * embed_dim), embed_dim),
            "b_in":  u(ks[1], (3 * embed_dim,), embed_dim),
            "w_out": u(ks[2], (embed_dim, embed_dim), embed_dim),
            "b_out": u(ks[3], (embed_dim,), embed_dim),
            "w_ff1": u(ks[4], (embed_dim, ffn), embed_dim),
            "b_ff1": u(ks[5], (ffn,), embed_dim),
            "w_ff2": u(ks[6], (ffn, embed_dim), ffn),
            "b_ff2": u(ks[7], (embed_dim,), ffn),
            "ln1_g": jnp.ones((embed_dim,), jnp.float32),
            "ln1_b": jnp.zeros((embed_dim,), jnp.float32),
            "ln2_g": jnp.ones((embed_dim,), jnp.float32),
            "ln2_b": jnp.zeros((embed_dim,), jnp.float32),
        })
    return params


def bert_reference(params, tok_ids, seg_ids):
    B, S = tok_ids.shape
    D = params["tok_table"].shape[1]
    H = params["num_heads"]
    dh = D // H
    hi = jax.lax.Precision.HIGHEST

    x = (params["tok_table"][tok_ids]
         + params["seg_table"][seg_ids]
         + params["pos_table"][jnp.arange(S)])                       # (B, S, D)

    def ln(v, g, b, eps=1e-5):
        m = jnp.mean(v, axis=-1, keepdims=True)
        c = v - m
        var = jnp.mean(c * c, axis=-1, keepdims=True)
        return c * jax.lax.rsqrt(var + eps) * g + b

    for layer in params["layers"]:
        qkv = jnp.einsum("bsd,df->bsf", x, layer["w_in"], precision=hi) + layer["b_in"]
        q, k, v = jnp.split(qkv, 3, axis=-1)

        def heads(t):
            return t.reshape(B, S, H, dh).transpose(0, 2, 1, 3)

        q, k, v = heads(q), heads(k), heads(v)
        s = jnp.einsum("bhqd,bhkd->bhqk", q, k, precision=hi) / math.sqrt(dh)
        p = jax.nn.softmax(s, axis=-1)
        a = jnp.einsum("bhqk,bhkd->bhqd", p, v, precision=hi)
        a = a.transpose(0, 2, 1, 3).reshape(B, S, D)
        a = jnp.einsum("bsd,df->bsf", a, layer["w_out"], precision=hi) + layer["b_out"]
        x = ln(x + a, layer["ln1_g"], layer["ln1_b"])
        h = jax.nn.relu(jnp.einsum("bsd,df->bsf", x, layer["w_ff1"], precision=hi)
                        + layer["b_ff1"])
        h = jnp.einsum("bsf,fd->bsd", h, layer["w_ff2"], precision=hi) + layer["b_ff2"]
        x = ln(x + h, layer["ln2_g"], layer["ln2_b"])
    return x


if __name__ == "__main__":
    # Small, TPU-friendly shapes consistent with the module.
    vocab_size = 64
    n_segment = 2
    max_len = 16
    embed_dim = 128          # lane-aligned hidden size
    n_layers = 2
    attn_heads = 4
    batch, seq = 2, max_len  # the reference module requires seq == max_len

    key = jax.random.PRNGKey(0)
    k_params, k_tok, k_seg = jax.random.split(key, 3)
    params = init_params(k_params, vocab_size=vocab_size, n_segment=n_segment,
                         max_len=max_len, embed_dim=embed_dim,
                         n_layers=n_layers, attn_heads=attn_heads)
    tok_ids = jax.random.randint(k_tok, (batch, seq), 0, vocab_size, dtype=jnp.int32)
    seg_ids = jax.random.randint(k_seg, (batch, seq), 0, n_segment, dtype=jnp.int32)

    ref = bert_reference(params, tok_ids, seg_ids)

    # f32 path
    out = jax.block_until_ready(bert_forward(params, tok_ids, seg_ids))
    assert out.shape == (batch, seq, embed_dim)
    err = float(jnp.max(jnp.abs(out - ref)))
    assert err < 5e-2, f"f32 max abs err = {err}"

    # bf16 fast path (v6e/v7x MXU dtype; f32 accumulation and f32 LN inside kernels)
    out_bf16 = jax.block_until_ready(
        bert_forward(params, tok_ids, seg_ids, compute_dtype=jnp.bfloat16))
    err16 = float(jnp.max(jnp.abs(out_bf16.astype(jnp.float32) - ref)))
    assert err16 < 0.3, f"bf16 max abs err = {err16}"

    print("KERNEL_OK")
</pallas_src>

<mosaic_0001>
module attributes {stable_mosaic.version = 11 : i64} {
  func.func @_embedding_kernel(%arg0: i32, %arg1: memref<2x16xi32, #tpu.memory_space<smem>>, %arg2: memref<1x1x16xi32, #tpu.memory_space<vmem>>, %arg3: memref<2x128xf32, #tpu.memory_space<vmem>>, %arg4: memref<16x128xf32, #tpu.memory_space<vmem>>, %arg5: memref<64x128xf32, #tpu.memory_space<any>>, %arg6: memref<1x16x128xf32, #tpu.memory_space<vmem>>, %arg7: memref<16x128xf32, #tpu.memory_space<vmem>>, %arg8: memref<2x!tpu.dma_semaphore, #tpu.memory_space<semaphore_mem>>) attributes {dimension_semantics = [#tpu.dimension_semantics<parallel>], iteration_bounds = array<i64: 2>, scalar_prefetch = 1 : i64, scratch_operands = 2 : i64, tpu.core_type = #tpu.core_type<tc>, window_params = [{transform_indices = @transform_0, window_bounds = array<i64: 1, 1, 16>}, {pipeline_mode = #tpu.pipeline_mode<synchronous>, transform_indices = @transform_1, window_bounds = array<i64: 2, 128>}, {pipeline_mode = #tpu.pipeline_mode<synchronous>, transform_indices = @transform_2, window_bounds = array<i64: 16, 128>}, {}, {transform_indices = @transform_4, window_bounds = array<i64: 1, 16, 128>}]} {
    %0 = arith.index_cast %arg0 : i32 to index
    %c0 = arith.constant 0 : index
    %1 = memref.load %arg1[%0, %c0] : memref<2x16xi32, #tpu.memory_space<smem>>
    %c0_i32 = arith.constant 0 : i32
    %c0_i32_0 = arith.constant 0 : i32
    %2 = tpu.memref_slice %arg5[%1, %c0_i32_0] : memref<64x128xf32, #tpu.memory_space<any>> -> memref<1x128xf32, #tpu.memory_space<any>>
    %c0_i32_1 = arith.constant 0 : i32
    %c0_i32_2 = arith.constant 0 : i32
    %3 = tpu.memref_slice %arg7[%c0_i32_1, %c0_i32_2] : memref<16x128xf32, #tpu.memory_space<vmem>> -> memref<1x128xf32, #tpu.memory_space<vmem>>
    %4 = tpu.memref_slice %arg8[%c0_i32] : memref<2x!tpu.dma_semaphore, #tpu.memory_space<semaphore_mem>> -> memref<1x!tpu.dma_semaphore, #tpu.memory_space<semaphore_mem>>
    %5 = tpu.memref_squeeze %4 : memref<1x!tpu.dma_semaphore, #tpu.memory_space<semaphore_mem>> -> memref<!tpu.dma_semaphore, #tpu.memory_space<semaphore_mem>>
    tpu.enqueue_dma source(%2 : memref<1x128xf32, #tpu.memory_space<any>>) target(%3 : memref<1x128xf32, #tpu.memory_space<vmem>>) target_semaphore(%5 : memref<!tpu.dma_semaphore, #tpu.memory_space<semaphore_mem>>)
    %c0_i32_3 = arith.constant 0 : i32
    %c16_i32 = arith.constant 16 : i32
    %6 = arith.addi %c0_i32_3, %c16_i32 : i32
    %c1_i32 = arith.constant 1 : i32
    scf.for %arg9 = %c0_i32_3 to %6 step %c1_i32  : i32 {
      %c1_i32_17 = arith.constant 1 : i32
      %23 = arith.muli %arg9, %c1_i32_17 : i32
      %c0_i32_18 = arith.constant 0 : i32
      %24 = arith.addi %c0_i32_18, %23 : i32
      %c2_i32 = arith.constant 2 : i32
      %c0_i32_19 = arith.constant 0 : i32
      %25 = arith.cmpi eq, %c2_i32, %c0_i32_19 : i32
      %c1_i32_20 = arith.constant 1 : i32
      %26 = arith.select %25, %c1_i32_20, %c2_i32 : i32
      %27 = arith.remsi %24, %26 : i32
      %c0_i32_21 = arith.constant 0 : i32
      %28 = arith.cmpi ne, %27, %c0_i32_21 : i32
      %c0_i32_22 = arith.constant 0 : i32
      %29 = arith.cmpi slt, %27, %c0_i32_22 : i32
      %c0_i32_23 = arith.constant 0 : i32
      %30 = arith.cmpi slt, %26, %c0_i32_23 : i32
      %31 = arith.xori %29, %30 : i1
      %32 = arith.andi %31, %28 : i1
      %33 = arith.addi %27, %26 : i32
      %34 = arith.select %32, %33, %27 : i32
      %c1_i32_24 = arith.constant 1 : i32
      %35 = arith.addi %24, %c1_i32_24 : i32
      %c16_i32_25 = arith.constant 16 : i32
      %36 = arith.cmpi slt, %35, %c16_i32_25 : i32
      %37 = arith.extui %36 : i1 to i32
      %c0_i32_26 = arith.constant 0 : i32
      %38 = arith.cmpi ne, %37, %c0_i32_26 : i32
      scf.if %38 {
        %c1_i32_29 = arith.constant 1 : i32
        %46 = arith.addi %24, %c1_i32_29 : i32
        %c1_i32_30 = arith.constant 1 : i32
        %47 = arith.subi %c1_i32_30, %34 : i32
        %48 = arith.index_cast %arg0 : i32 to index
        %49 = arith.index_cast %46 : i32 to index
        %50 = memref.load %arg1[%48, %49] : memref<2x16xi32, #tpu.memory_space<smem>>
        %c0_i32_31 = arith.constant 0 : i32
        %51 = tpu.memref_slice %arg5[%50, %c0_i32_31] : memref<64x128xf32, #tpu.memory_space<any>> -> memref<1x128xf32, #tpu.memory_space<any>>
        %c0_i32_32 = arith.constant 0 : i32
        %52 = tpu.memref_slice %arg7[%46, %c0_i32_32] : memref<16x128xf32, #tpu.memory_space<vmem>> -> memref<1x128xf32, #tpu.memory_space<vmem>>
        %53 = tpu.memref_slice %arg8[%47] : memref<2x!tpu.dma_semaphore, #tpu.memory_space<semaphore_mem>> -> memref<1x!tpu.dma_semaphore, #tpu.memory_space<semaphore_mem>>
        %54 = tpu.memref_squeeze %53 : memref<1x!tpu.dma_semaphore, #tpu.memory_space<semaphore_mem>> -> memref<!tpu.dma_semaphore, #tpu.memory_space<semaphore_mem>>
        tpu.enqueue_dma source(%51 : memref<1x128xf32, #tpu.memory_space<any>>) target(%52 : memref<1x128xf32, #tpu.memory_space<vmem>>) target_semaphore(%54 : memref<!tpu.dma_semaphore, #tpu.memory_space<semaphore_mem>>)
      } else {
      }
      %39 = arith.index_cast %arg0 : i32 to index
      %40 = arith.index_cast %24 : i32 to index
      %41 = memref.load %arg1[%39, %40] : memref<2x16xi32, #tpu.memory_space<smem>>
      %c0_i32_27 = arith.constant 0 : i32
      %42 = tpu.memref_slice %arg5[%41, %c0_i32_27] : memref<64x128xf32, #tpu.memory_space<any>> -> memref<1x128xf32, #tpu.memory_space<any>>
      %c0_i32_28 = arith.constant 0 : i32
      %43 = tpu.memref_slice %arg7[%24, %c0_i32_28] : memref<16x128xf32, #tpu.memory_space<vmem>> -> memref<1x128xf32, #tpu.memory_space<vmem>>
      %44 = tpu.memref_slice %arg8[%34] : memref<2x!tpu.dma_semaphore, #tpu.memory_space<semaphore_mem>> -> memref<1x!tpu.dma_semaphore, #tpu.memory_space<semaphore_mem>>
      %45 = tpu.memref_squeeze %44 : memref<1x!tpu.dma_semaphore, #tpu.memory_space<semaphore_mem>> -> memref<!tpu.dma_semaphore, #tpu.memory_space<semaphore_mem>>
      tpu.wait_dma2 semaphore(%45 : memref<!tpu.dma_semaphore, #tpu.memory_space<semaphore_mem>>) src(%42 : memref<1x128xf32, #tpu.memory_space<any>>) dst(%43 : memref<1x128xf32, #tpu.memory_space<vmem>>)
    }
    %c16_i32_4 = arith.constant 16 : i32
    %c0_5 = arith.constant 0 : index
    %c0_6 = arith.constant 0 : index
    %7 = vector.load %arg7[%c0_5, %c0_6] : memref<16x128xf32, #tpu.memory_space<vmem>>, vector<16x128xf32>
    %c0_7 = arith.constant 0 : index
    %c0_8 = arith.constant 0 : index
    %c0_9 = arith.constant 0 : index
    %8 = vector.load %arg2[%c0_7, %c0_8, %c0_9] : memref<1x1x16xi32, #tpu.memory_space<vmem>>, vector<1x1x16xi32>
    %9 = vector.shape_cast %8 : vector<1x1x16xi32> to vector<1x16xi32>
    %10 = tpu.iota {dimensions = array<i32: 0>} : vector<2x16xi32>
    %11 = vector.broadcast %9 : vector<1x16xi32> to vector<2x16xi32>
    %12 = arith.cmpi eq, %10, %11 : vector<2x16xi32>
    %13 = arith.extui %12 : vector<2x16xi1> to vector<2x16xi32>
    %14 = arith.sitofp %13 : vector<2x16xi32> to vector<2x16xf32>
    %c0_10 = arith.constant 0 : index
    %c0_11 = arith.constant 0 : index
    %15 = vector.load %arg3[%c0_10, %c0_11] : memref<2x128xf32, #tpu.memory_space<vmem>>, vector<2x128xf32>
    %cst = arith.constant dense<0.000000e+00> : vector<16x128xf32>
    %16 = tpu.matmul %14, %15, %cst {dimension_numbers = #tpu.dot_dimension_numbers<[0], [0], [1], [1], [0, 1, 1, 1], [], []>} : vector<2x16xf32>, vector<2x128xf32>, vector<16x128xf32> -> vector<16x128xf32>
    %c0_12 = arith.constant 0 : index
    %c0_13 = arith.constant 0 : index
    %17 = vector.load %arg4[%c0_12, %c0_13] : memref<16x128xf32, #tpu.memory_space<vmem>>, vector<16x128xf32>
    %18 = arith.addf %7, %16 : vector<16x128xf32>
    %19 = arith.addf %18, %17 : vector<16x128xf32>
    %c0_14 = arith.constant 0 : index
    %c0_15 = arith.constant 0 : index
    %c0_16 = arith.constant 0 : index
    %20 = vector.load %arg6[%c0_14, %c0_15, %c0_16] : memref<1x16x128xf32, #tpu.memory_space<vmem>>, vector<1x16x128xf32>
    %21 = vector.shape_cast %20 : vector<1x16x128xf32> to vector<16x128xf32>
    %22 = vector.shape_cast %19 : vector<16x128xf32> to vector<1x16x128xf32>
    tpu.vector_store %arg6[%c0_14, %c0_15, %c0_16], %22 {strides = array<i32>} : memref<1x16x128xf32, #tpu.memory_space<vmem>>, vector<1x16x128xf32>,
    return
  }
  func.func @transform_0(%arg0: i32, %arg1: memref<2x16xi32, #tpu.memory_space<smem>>) -> (i32, i32, i32) {
    %c0_i32 = arith.constant 0 : i32
    %c0_i32_0 = arith.constant 0 : i32
    %c0_i32_1 = arith.constant 0 : i32
    return %arg0, %c0_i32, %c0_i32_0 : i32, i32, i32
  }
  func.func @transform_1(%arg0: i32, %arg1: memref<2x16xi32, #tpu.memory_space<smem>>) -> (i32, i32) {
    %c0_i32 = arith.constant 0 : i32
    %c0_i32_0 = arith.constant 0 : i32
    %c0_i32_1 = arith.constant 0 : i32
    return %c0_i32, %c0_i32_0 : i32, i32
  }
  func.func @transform_2(%arg0: i32, %arg1: memref<2x16xi32, #tpu.memory_space<smem>>) -> (i32, i32) {
    %c0_i32 = arith.constant 0 : i32
    %c0_i32_0 = arith.constant 0 : i32
    %c0_i32_1 = arith.constant 0 : i32
    return %c0_i32, %c0_i32_0 : i32, i32
  }
  func.func @transform_4(%arg0: i32, %arg1: memref<2x16xi32, #tpu.memory_space<smem>>) -> (i32, i32, i32) {
    %c0_i32 = arith.constant 0 : i32
    %c0_i32_0 = arith.constant 0 : i32
    %c0_i32_1 = arith.constant 0 : i32
    return %arg0, %c0_i32, %c0_i32_0 : i32, i32, i32
  }
}

</mosaic_0001>

<bundles_post_ra>
// kernel: tpu_custom_call.1
= control target key start
LH: loop header
LB: loop body
LE: loop exit
PB: predicated region body
PF: predicated region fallthrough
CT: control target
= control target key end

     0   :  { %s1059_s0 = inlined_call_operand.hbm [shape: s32[2,16], index: 0, kind: input, shape index: {}]   ;;  %s1060_s1 = inlined_call_operand.vmem [shape: s32[2,1,16], index: 1, kind: input, shape index: {}]   ;;  %s1061_s2 = inlined_call_operand.vmem [shape: f32[2,128], index: 2, kind: input, shape index: {}]   ;;  %s1062_s3 = inlined_call_operand.hbm [shape: f32[16,128], index: 3, kind: input, shape index: {}]   ;;  %s1063_s4 = inlined_call_operand.hbm [shape: f32[64,128], index: 4, kind: input, shape index: {}]   ;;  %s1064_s5 = inlined_call_operand.hbm [shape: f32[2,16,128], index: 5, kind: output, shape index: {}]  }
   0x1   :  { %1075 = sst [smem:[#allocation25_spill]] %s1062_s3  ;;  %s614_s20 = scalar_lea.hbm %s1059_s0, 32 }
   0x2   :  { %p615_p0 = scmp.ne.s32.totalorder %s1059_s0, %s614_s20  ;;  %p618_p1 = scmp.lt.u32.totalorder %s614_s20, %s1059_s0 }
   0x4   :  { %p620_p2 = pnand %p618_p1, %p615_p0 }
   0x6   :  { %623 = shalt.err (!%p620_p2)  }
   0x7   :  { %s784_s25 = smov [#allocation5]  }
   0x8   :  { %11 = dma.hbm_to_smem %s1059_s0, 32, %s784_s25, [#allocation4] }
   0x9   :  { %752 = dma.done.wait [#allocation4], 32 }
   0xa   :  { %753 = vsyncadd [#allocation4], 4294967264 }
   0xb   :  { %13 = sfence }
   0xc   :  { %14 = vsyncpa [#allocation7], 0 }
   0xd   :  { %15 = vsyncpa [#allocation8], 0 }
   0xe   :  { %17 = vsyncpa [#allocation8 + $0x1], 0  ;;  %s835_s28 = smov 0   ;;  %s837_s29 = smov 0  }
   0xf   :  { %s839_s30 = smov 0   ;;  %s841_s6 = smov 0  }
  0x10 LB: > { %1076 = sst [smem:[#allocation21_spill]] %s774_s30  ;;  %s856_s0 = sadd.s32 4294967295, %s778_s6   ;;  %s778_s6 = sphi %s841_s6, %s1097_s6   ;;  %s774_s30 = sphi %s839_s30, %s1099_s30   ;;  %s770_s29 = sphi %s837_s29, %s1101_s29   ;;  %s766_s28 = sphi %s835_s28, %s1100_s28  }
  0x11   : > { %s508_s7 = sadd.s32 4294967294, %s778_s6   ;;  %s860_s8 = sadd.s32 1, %s778_s6  }
  0x12   : > { %1077 = sst [smem:[#allocation22_spill]] %s860_s8  ;;  %s98_s9 = sadd.s32 1, %s774_s30 }
  0x13   : > { %s95_s10 = ssub.s32 %s778_s6, %s860_s8  ;;  %p108_p3 = scmp.ne.s32.totalorder %s774_s30, %s770_s29 }
  0x14   : > { %p96_p4 = scmp.eq.s32.totalorder %s95_s10, 0  ;;  %p109_p5 = scmp.eq.s32.totalorder %s856_s0, 1 }
  0x15   : > { %p114_p6 = scmp.ne.s32.totalorder %s770_s29, %s766_s28  ;;  %p115_p7 = scmp.eq.s32.totalorder %s508_s7, 1 }
  0x16   : > { %s871_s11 = scalar_select %p96_p4, %s774_s30, %s98_s9  }
  0x17   : > { %p873_p8 = por %p109_p5, %p108_p3  ;;  %p877_p9 = por %p115_p7, %p114_p6 }
  0x18   : > { %1078 = sst [smem:[#allocation23_spill]] %s871_s11  ;;  %p509_p10 = scmp.ge.s32.totalorder %s778_s6, 1 }
  0x19   : > { %s1079_s12 = scalar_select %p873_p8, 1, 0 }
  0x1a   : > { %s1080_s13 = scalar_select %p877_p9, 1, 0 }
  0x1b   : > { %p122_p11 = scmp.lt.s32.totalorder %s778_s6, 3  ;;  %p1065_p12 = scmp.eq.s32.totalorder %s856_s0, 0 }
  0x1c   : > { %1081 = sst [smem:[#allocation24_spill]] %s1080_s13  ;;  %s785_s15 = smov [#allocation6]  }
  0x1d   : > { %p884_p13 = pnand %p509_p10, %p122_p11  ;;  %s137_s16 = sshll.u32 %s785_s15, 4  ;;  %s138_s16 = int_to_ptr.vmem [resolvable:$true] %s137_s16 }
  0x1e   : > { %s1084_s3 = sld [smem:[#allocation25_spill]] }
  0x1f   : > { %s1082_s14 = scalar_select %p884_p13, 1, 0 }
  0x20   : > { %p554_p0 = pneg %p884_p13 }
  0x22   : > { %p892_p1 = pnand %p1065_p12, %p554_p0 }
  0x24   : > { %s624_s20 = scalar_lea.hbm %s1084_s3, 256  ;;  %p626_p3 = pneg %p892_p1 }
  0x25   : > { %p625_p2 = scmp.ne.s32.totalorder %s1084_s3, %s624_s20  ;;  %p631_p6 = scmp.lt.u32.totalorder %s624_s20, %s1084_s3 }
  0x27   : > { %p627_p4 = pnand %p626_p3, %p625_p2 }
  0x29   : > { %p628_p5 = pneg %p627_p4 }
  0x2b   : > { %p633_p7 = pnand %p631_p6, %p628_p5 }
  0x2d   : > { %636 = shalt.err (!%p633_p7)
}
  0x2e   : > { %s637_s25 = scalar_lea.vmem %s138_s16, 256  ;;  %p645_p12 = scmp.lt.s32.totalorder %s138_s16, %s138_s16 }
  0x2f   : > { %p638_p10 = scmp.ne.s32.totalorder %s138_s16, %s637_s25  ;;  %p646_p9 = scmp.lt.s32.totalorder %s637_s25, %s637_s25 }
  0x31   : > { %p640_p11 = pnand %p638_p10, %p626_p3  ;;  %p647_p8 = por %p646_p9, %p645_p12 }
  0x33   : > { %p641_p0 = pneg %p640_p11 }
  0x35   : > { %p648_p13 = pnand %p647_p8, %p641_p0 }
  0x37   : > { %651 = shalt.err (!%p648_p13)
}
  0x38   : > { %s786_s26 = smov 128   ;;  %s787_s27 = smov 8  }
  0x39   : > { %557 = dma.hbm_to_vmem [thread:$0]  (!%p892_p1), %s1084_s3, 256, %s138_s16, [#allocation7], %s786_s26, %s786_s26, %s787_s27  }
  0x3a   : > { %p1085_p2 = scmp.ne.s32.totalorder %s1082_s14, 0 }
  0x3b   : > { %p1086_p4 = scmp.eq.s32.totalorder (!%p1085_p2), %s856_s0, 0 }
  0x3c   : > { %159 = sbr.rel (%p1085_p2) target bundleno = 511 (0x1ff), region = 32 }
  0x43   : > { %755 = dma.done.wait (%p1086_p4), [#allocation7], 256   ;;  %p1087_p3 = pmov %p1086_p4 }
  0x44   : > { %s515_s10 = sshll.u32 %s856_s0, 7  ;;  %s1068_s15 = sand.u32 1, %s770_s29  }
  0x45   : > { %757 = vsyncadd (%p1087_p3), [#allocation7], 4294967040  ;;  %s185_s17 = sld [smem:[#allocation5 + %s515_s10]]  ;;  %s514_s18 = sshll.u32 %s1068_s15, 4 }
  0x46   : > { %p181_p8 = scmp.lt.s32.totalorder %s856_s0, 1  ;;  %s788_s14 = smov [#allocation2]  }
  0x47   : > { %s195_s19 = sshll.u32 %s788_s14, 4  ;;  %s1070_s10 = scalar_lea.hbm %s1063_s4, 1024  ;;  %s930_s19 = int_to_ptr.vmem [resolvable:$true] %s195_s19 }
  0x48   : > { %s924_s16 = scalar_select %p181_p8, %s856_s0, 1 }
  0x4b   : > { %s516_s23 = sshll.u32 %s185_s17, 4 }
  0x4c   : > { %s187_s26 = scalar_lea.hbm %s1063_s4, %s516_s23 }
  0x4d   : > { %s652_s27 = scalar_lea.hbm %s187_s26, 16  ;;  %p655_p12 = scmp.lt.u32.totalorder %s187_s26, %s1063_s4 }
  0x4e   : > { %p653_p9 = scmp.ne.s32.totalorder %s187_s26, %s652_s27  ;;  %p656_p13 = scmp.lt.u32.totalorder %s1070_s10, %s652_s27 }
  0x4f   : > { %p658_p5 = scmp.lt.u32.totalorder %s652_s27, %s187_s26 }
  0x50   : > { %p657_p1 = por %p656_p13, %p655_p12 }
  0x52   : > { %p659_p6 = por %p658_p5, %p657_p1 }
  0x54   : > { %p660_p7 = pnand %p659_p6, %p653_p9 }
  0x56   : > { %663 = shalt.err (!%p660_p7)  }
  0x57   : > { %s664_s17 = scalar_lea.vmem %s930_s19, 16  ;;  %s1069_s21 = scalar_lea.vmem %s930_s19, 256 }
  0x58   : > { %p665_p10 = scmp.ne.s32.totalorder %s930_s19, %s664_s17  ;;  %p669_p11 = scmp.lt.s32.totalorder %s930_s19, %s930_s19 }
  0x59   : > { %p670_p0 = scmp.lt.s32.totalorder %s1069_s21, %s664_s17 }
  0x5b   : > { %p671_p2 = por %p670_p0, %p669_p11 }
  0x5d   : > { %p672_p4 = pnand %p671_p2, %p665_p10 }
  0x5f   : > { %675 = shalt.err (!%p672_p4)  }
  0x60   : > { %198 = dma.hbm_to_vmem [thread:$0]  %s187_s26, 16, %s930_s19, [#allocation3] }
  0x61   : > { %s953_s3 = scalar_lea.vmem [#allocation9], %s514_s18  ;;  %s955_s15 = smov 0  }
  0x62 LB: >> { %p205_p3 = scmp.lt.s32.totalorder %s782_s15, 0  ;;  %s206_s23 = ssub.s32 0, %s782_s15  ;;  %s782_s15 = sphi %s955_s15, %s1090_s15  }
  0x63   : >> { %s517_s24 = smin.u32 %s782_s15, %s206_s23  ;;  %s958_s25 = sadd.s32 1, %s782_s15  }
  0x64   : >> { %s208_s18 = sand.u32 1, %s517_s24   ;;  %p564_p9 = scmp.lt.s32.totalorder %s958_s25, 16 }
  0x65   : >> { %s209_s26 = ssub.s32 0, %s208_s18  ;;  %s223_s27 = sshra.s32 %s958_s25, 7 }
  0x66   : >> { %s1103_s26 = smov (!%p205_p3, %s209_s26), %s208_s18  ;;  %s225_s9 = sadd.s32 %s856_s0, %s223_s27 }
  0x67   : >> { %p519_p12 = scmp.lt.s32.totalorder %s1103_s26, 0  ;;  %s215_s7 = sadd.s32 2, %s1103_s26 }
  0x68   : >> { %s228_s14 = sand.u32 127, %s958_s25  ;;  %s521_s20 = sshll.u32 %s225_s9, 7 }
  0x69   : >> { %s1105_s7 = smov (!%p519_p12, %s215_s7), %s1103_s26  ;;  %s229_s17 = sadd.s32 %s521_s20, %s228_s14 }
  0x6a   : >> { %s549_s23 = scalar_select %p564_p9, [#allocation5], [#allocation16] }
  0x6b   : >> { %s1107_s17 = smov (!%p564_p9, %s229_s17), 0  ;;  %s461_s24 = scalar_lea.vmem [#allocation2], %s782_s15 }
  0x6c   : >> { %s462_s22 = scalar_lea.vmem %s461_s24, 1 [#allocation2]  ;;  %s230_s21 = sld [smem:[%s549_s23 + %s1107_s17]] }
  0x6d   : >> { %s222_s18 = ssub.s32 1, %s1105_s7  ;;  %s242_s10 = sshll.u32 %s462_s22, 4  ;;  %s243_s10 = int_to_ptr.vmem [resolvable:$true] %s242_s10 }
  0x6e   : >> { %s234_s8 = scalar_lea.sflag [#allocation3], %s222_s18  ;;  %s1088_s22 = scalar_lea.hbm %s1063_s4, 1024 }
  0x72   : >> { %s522_s11 = sshll.u32 %s230_s21, 4 }
  0x73   : >> { %s232_s26 = scalar_lea.hbm %s1063_s4, %s522_s11 }
  0x74   : >> { %s676_s13 = scalar_lea.hbm %s232_s26, 16  ;;  %p681_p6 = scmp.lt.u32.totalorder %s232_s26, %s1063_s4 }
  0x75   : >> { %p677_p13 = scmp.ne.s32.totalorder %s232_s26, %s676_s13  ;;  %p682_p7 = scmp.lt.u32.totalorder %s1088_s22, %s676_s13 }
  0x76   : >> { %p684_p11 = scmp.lt.u32.totalorder %s676_s13, %s232_s26 }
  0x77   : >> { %p678_p1 = pnand %p677_p13, %p564_p9  ;;  %p683_p10 = por %p682_p7, %p681_p6 }
  0x79   : >> { %p679_p5 = pneg %p678_p1  ;;  %p685_p0 = por %p684_p11, %p683_p10 }
  0x7b   : >> { %p686_p2 = pnand %p685_p0, %p679_p5 }
  0x7d   : >> { %689 = shalt.err (!%p686_p2)  }
  0x7e   : >> { %s690_s30 = scalar_lea.vmem %s243_s10, 16  ;;  %p697_p13 = scmp.lt.s32.totalorder %s243_s10, %s930_s19 }
  0x7f   : >> { %p691_p4 = scmp.ne.s32.totalorder %s243_s10, %s690_s30  ;;  %s1089_s11 = scalar_lea.vmem %s930_s19, 256 }
  0x80   : >> { %p698_p1 = scmp.lt.s32.totalorder %s1089_s11, %s690_s30 }
  0x81   : >> { %p692_p3 = pnand %p691_p4, %p564_p9 }
  0x82   : >> { %p699_p8 = por %p698_p1, %p697_p13 }
  0x83   : >> { %p693_p12 = pneg %p692_p3 }
  0x85   : >> { %p700_p6 = pnand %p699_p8, %p693_p12 }
  0x87   : >> { %703 = shalt.err (!%p700_p6)  }
  0x88   : >> { %551 = dma.hbm_to_vmem [thread:$0]  (%p564_p9), %s232_s26, 16, %s243_s10, %s234_s8 }
  0x89   : >> { %s254_s13 = scalar_lea.sflag [#allocation3], %s1105_s7 }
  0x8a   : >> { %758 = dma.done.wait %s254_s13, 16 }
  0x8b   : >> { %759 = vsyncadd %s254_s13, 4294967280  ;;  %s1090_s15 = smov %s958_s25  ;;  %p1091_p5 = scmp.ge.s32.totalorder %s958_s25, 16 }
  0x8c   : > { %v261_v0 = vlaneseq (%p1091_p5)  ;;  %s1092_s23 = scalar_lea.vmem (%p1091_p5), %s1060_s1, %s924_s16  ;;  %v789_v3 = vmov (%p1091_p5), 0.0   ;;  %v270_v5 = vld [vmem:[%s1061_s2] sm:$0x3] (%p1091_p5)  ;;  %vm310_vm1 = vcmask (%p1091_p5), 1041408   ;;  %vm303_vm2 = vcmask (%p1091_p5), 15360   ;;  %v259_v8 = vld [vmem:[#allocation2 + $0x8] sm:$0xff] (%p1091_p5) }
  0x8d   : > { %203 = sbr.rel (!%p1091_p5) target bundleno = 98 (0x62), region = 97  ;;  %v523_v1 = vld [vmem:[%s1092_s23] ss:$0 sm:$0xff] (%p1091_p5)  ;;  %539 = vmatprep.subr.msk.mxu0 (%p1091_p5), %vm310_vm1, %v270_v5  ;;  %v390_v11 = vld [vmem:[#allocation6 + $0x8] sm:$0xff] (%p1091_p5)  ;;  %s535_s16 = sshll.u32 (%p1091_p5), %s856_s0, 8  ;;  %v389_v14 = vld [vmem:[#allocation6] sm:$0xff] (%p1091_p5) }
  0x8e   : > { %v262_v2 = vshrl.u32 (%p1091_p5), %v261_v0, 7  ;;  %540 = vmatpush3.msk.msra.mxu0 (%p1091_p5), %vm310_vm1, %v270_v5  ;;  %v258_v9 = vld [vmem:[#allocation2] sm:$0xff] (%p1091_p5)  ;;  %s411_s19 = sshll.u32 (%p1091_p5), %s953_s3, 4  ;;  %s1010_s24 = scalar_lea.hbm (%p1091_p5), %s1064_s5, %s535_s16  ;;  %s1012_s19 = int_to_ptr.vmem [resolvable:$true] %s411_s19 }
  0x8f   : > { %s1093_s0 = sand.u32 (%p1091_p5), 1, %s770_s29   ;;  %s704_s27 = scalar_lea.vmem (%p1091_p5), %s1012_s19, 256 }
  0x90   : > { %vm267_vm0 = vcmp.eq.s32.totalorder (%p1091_p5), %v262_v2, %v523_v1  ;;  %s1018_s18 = scalar_lea.sflag (%p1091_p5), [#allocation8], %s1093_s0  ;;  %p705_p8 = scmp.ne.s32.totalorder (%p1091_p5), %s1012_s19, %s704_s27 }
  0x91   : > { %v524_v4 = vsel (%p1091_p5), %vm267_vm0, 1.0, %v789_v3  ;;  %p1094_p9 = scmp.ne.s32.totalorder (%p1091_p5), %s1079_s12, 0  ;;  %s790_s26 = smov (%p1091_p5), [#allocation9]  }
  0x92   : > { %271 = vxpose.xlu0.b32.start.end [1/1] (short) (narrow) (%p1091_p5), %v524_v4, 16  ;;  %s708_s9 = sshll.u32 (%p1091_p5), %s790_s26, 4  ;;  %s709_s9 = int_to_ptr.vmem [resolvable:$false] %s708_s9 }
  0x93   : > { %p706_p7 = pnand (%p1091_p5), %p705_p8, %p1094_p9  ;;  %s710_s14 = scalar_lea.vmem (%p1091_p5), %s709_s9, 512 }
  0x94   : > { %p711_p11 = scmp.lt.s32.totalorder %s1012_s19, %s709_s9  ;;  %p712_p0 = scmp.lt.s32.totalorder %s710_s14, %s704_s27 }
  0x95   : > { %p707_p10 = pneg %p706_p7 }
  0x96   : > { %p713_p2 = por %p712_p0, %p711_p11 }
  0x98   : > { %p714_p4 = pnand %p713_p2, %p707_p10 }
 0x112   : > { %v287_v6 = vpop.trf.xlu0 }
 0x113   : > { %541 = vmatprep.mubr.msk.f32.mxu0 %vm303_vm2, %v287_v6 }
 0x116   : > { %v288_v7 = vpop.trf.xlu0 }
 0x117   : > { %542 = vmatmul.mubr.msk.f32.vlgmr.msra.gmra.mrb[0].mxu0 %vm303_vm2, %v288_v7 }
 0x1ea   : > { %v543_v10 = vpop.f32.mrb[0].mxu0 }
 0x1eb   : > { %v392_v12 = vadd.f32 %v543_v10, %v259_v8  ;;  %v380_v13 = vpop.f32.mrb[1].mxu0 }
 0x1ec   : > { %v391_v15 = vadd.f32 %v380_v13, %v258_v9 }
 0x1ed   : > { %v394_v16 = vadd.f32 %v392_v12, %v390_v11 }
 0x1ee   : > { %v393_v17 = vadd.f32 %v391_v15, %v389_v14 }
 0x1ef   : > { %396 = vst [vmem:[%s953_s3 + $0x8] sm:$0xff] %v394_v16 }
 0x1f0   : > { %395 = vst [vmem:[%s953_s3] sm:$0xff] %v393_v17 }
 0x1f1   : > { %717 = shalt.err (!%p714_p4)
}
 0x1f2   : > { %s718_s3 = scalar_lea.hbm %s1010_s24, 256  ;;  %s722_s22 = scalar_lea.hbm %s1064_s5, 512 }
 0x1f3   : > { %p719_p3 = scmp.ne.s32.totalorder %s1010_s24, %s718_s3  ;;  %p723_p1 = scmp.lt.u32.totalorder %s1010_s24, %s1064_s5 }
 0x1f4   : > { %p724_p6 = scmp.lt.u32.totalorder %s722_s22, %s718_s3  ;;  %p726_p8 = scmp.lt.u32.totalorder %s718_s3, %s1010_s24 }
 0x1f5   : > { %p720_p12 = pnand %p719_p3, %p1094_p9 }
 0x1f6   : > { %p725_p5 = por %p724_p6, %p723_p1 }
 0x1f7   : > { %p721_p13 = pneg %p720_p12 }
 0x1f8   : > { %p727_p7 = por %p726_p8, %p725_p5 }
 0x1fa   : > { %p728_p10 = pnand %p727_p7, %p721_p13 }
 0x1fc   : > { %731 = shalt.err (!%p728_p10)
}
 0x1fd   : > { %s791_s13 = smov 128   ;;  %s792_s21 = smov 8  }
 0x1fe   : > { %552 = dma.vmem_to_hbm [thread:$0]  (%p1094_p9), %s1012_s19, 256, %s1010_s24, %s1018_s18, %s791_s13, %s791_s13, %s792_s21  }
 0x1ff PF: > { %s1095_s17 = sld [smem:[#allocation24_spill]]  ;;  %p565_p11 = scmp.ge.s32.totalorder %s778_s6, 2 }
 0x200   : > { %s426_s23 = sand.u32 1, %s766_s28  }
 0x201   : > { %s427_s8 = scalar_lea.sflag [#allocation8], %s426_s23 }
 0x205   : > { %p1096_p0 = scmp.ne.s32.totalorder %s1095_s17, 0 }
 0x207   : > { %p559_p2 = pnand %p565_p11, %p1096_p0 }
 0x209   : > { %761 = dma.done.wait (!%p559_p2), %s427_s8, 256  }
 0x20a   : > { %763 = vsyncadd (!%p559_p2), %s427_s8, 4294967040  ;;  %s1097_s6 = sld [smem:[#allocation22_spill]]  ;;  %s1098_s10 = sld [smem:[#allocation21_spill]] }
 0x20b   : > { %s1099_s30 = sld [smem:[#allocation23_spill]]  ;;  %s1100_s28 = smov %s770_s29 }
 0x210   : > { %p20_p4 = scmp.ge.s32.totalorder %s1097_s6, 4   ;;  %s1101_s29 = smov %s1098_s10 }
 0x212   :  { %22 = sbr.rel (!%p20_p4) target bundleno = 16 (0x10), region = 108 }
 0x219   :  { %432 = vsyncpa [#allocation7], 1 }
 0x21a   :  { %434 = vsyncpa [#allocation7 + $0x1], 1 }
 0x21b   :  { %435 = vsyncpa [#allocation8], 1 }
 0x21c   :  { %437 = vsyncpa [#allocation8 + $0x1], 1 }
 0x21d   :  { %438 = vsyncmov [#allocation3] }
 0x220   :  { %s439_s12 = vpop.sfrf %438 }
 0x221   :  { %p533_p9 = scmp.ne.s32.totalorder %s439_s12, 0 }
 0x223   :  { %443 = shalt.err (%p533_p9)  }
 0x224   :  { %445 = vsyncmov [#allocation3 + $0x1] }
 0x227   :  { %s446_s16 = vpop.sfrf %445 }
 0x228   :  { %p534_p3 = scmp.ne.s32.totalorder %s446_s16, 0 }
 0x22a   :  { %450 = shalt.err (%p534_p3)  }

</bundles_post_ra>
